<compile_context>
chip_gen: v5e
topology: v5e:2x2
jax: 0.10.0
libtpu: 0.0.40
codegen_flags: <defaults>
</compile_context>

<pallas_src>
import functools

import jax
import jax.numpy as jnp
from jax.experimental import pallas as pl
from jax.experimental.pallas import tpu as pltpu

_VMEM_LIMIT = 32 * 1024 * 1024  # explicit scoped-VMEM limit (safe on v5e/v6e/v7x)


# ----------------------------------------------------------------------------
# Kernel helpers
# ----------------------------------------------------------------------------
def _layernorm(v, g, b, eps=1e-5):
    mu = jnp.mean(v, axis=-1, keepdims=True)
    var = jnp.mean(jnp.square(v - mu), axis=-1, keepdims=True)
    return (v - mu) * jax.lax.rsqrt(var + eps) * g + b


def _linear_bias_kernel(x_ref, w_ref, b_ref, o_ref):
    # o = x @ w + b      x:(TILE_M,K) f32, w:(K,N) bf16, b:(1,N) f32
    o_ref[...] = (
        jnp.dot(x_ref[...].astype(jnp.bfloat16), w_ref[...],
                preferred_element_type=jnp.float32)
        + b_ref[...]
    )


def _tf_layer_kernel(
    x_ref, pos_ref,
    ln1_g_ref, ln1_b_ref, wqkv_ref, wo_ref, bo_ref,
    ln2_g_ref, ln2_b_ref, w1_ref, b1_ref, w2_ref, b2_ref,
    nrm_g_ref, nrm_b_ref,
    o_ref,
    acc_ref,
    *, depth, heads, dim_head,
):
    """One PreNorm(Attn)+res / PreNorm(FF)+res block per grid step along the depth axis.

    grid = (batch, depth).  The residual stream stays resident in `acc_ref` (VMEM, f32)
    across all depth steps of one batch block; the final LayerNorm is fused into the last
    step, which is the only step that writes `o_ref`.
    """
    l = pl.program_id(1)                       # depth step (innermost, "arbitrary")
    d = acc_ref.shape[-1]
    inner = heads * dim_head
    scale = dim_head ** -0.5

    # Step 0: load the input (first `d` feature columns of the source activation) and add
    # the positional embedding — both fused here so no pre-added/sliced HBM intermediate.
    @pl.when(l == 0)
    def _():
        acc_ref[...] = x_ref[...][:, :d] + pos_ref[...]

    x = acc_ref[...]                           # (seq, d) f32 residual stream

    # ---- PreNorm + multi-head self-attention + residual -----------------------------
    h = _layernorm(x, ln1_g_ref[0], ln1_b_ref[0])
    qkv = jnp.dot(h.astype(jnp.bfloat16), wqkv_ref[0],
                  preferred_element_type=jnp.float32)          # (seq, 3*inner) f32

    # Head split: static lane slices stacked into ONE leading batch axis so both attention
    # matmuls below are single head-batched dot_generals (no per-head MXU pushes).
    q = jnp.concatenate(
        [qkv[None, :, h_ * dim_head:(h_ + 1) * dim_head] for h_ in range(heads)], axis=0)
    k = jnp.concatenate(
        [qkv[None, :, inner + h_ * dim_head:inner + (h_ + 1) * dim_head]
         for h_ in range(heads)], axis=0)
    v = jnp.concatenate(
        [qkv[None, :, 2 * inner + h_ * dim_head:2 * inner + (h_ + 1) * dim_head]
         for h_ in range(heads)], axis=0)                      # each (H, seq, Dh)

    s = jnp.einsum('hqd,hkd->hqk', q.astype(jnp.bfloat16), k.astype(jnp.bfloat16),
                   preferred_element_type=jnp.float32) * scale  # (H, seq, seq)
    s = s - jnp.max(s, axis=-1, keepdims=True)
    e = jnp.exp(s)
    p = e * pl.reciprocal(jnp.sum(e, axis=-1, keepdims=True), approx=True)
    oh = jnp.einsum('hqk,hkd->hqd', p.astype(jnp.bfloat16), v.astype(jnp.bfloat16),
                    preferred_element_type=jnp.float32)         # (H, seq, Dh)

    # Recombine heads along the lane axis (head-major, matching wo's row order) and apply
    # the output projection as ONE full-K matmul (no per-head K=8 partial sums).
    oh_cat = jnp.concatenate([oh[h_] for h_ in range(heads)], axis=-1)   # (seq, inner)
    x = x + jnp.dot(oh_cat.astype(jnp.bfloat16), wo_ref[0],
                    preferred_element_type=jnp.float32) + bo_ref[0]

    # ---- PreNorm + FeedForward (Linear -> GELU -> Linear) + residual ----------------
    h2 = _layernorm(x, ln2_g_ref[0], ln2_b_ref[0])
    ff = jnp.dot(h2.astype(jnp.bfloat16), w1_ref[0],
                 preferred_element_type=jnp.float32) + b1_ref[0]
    ff = jax.nn.gelu(ff, approximate=False)    # exact erf GELU (PyTorch default)
    ff = jnp.dot(ff.astype(jnp.bfloat16), w2_ref[0],
                 preferred_element_type=jnp.float32) + b2_ref[0]
    x = x + ff

    acc_ref[...] = x

    # Final LayerNorm of the Transformer module, fused into the last depth step.
    @pl.when(l == depth - 1)
    def _():
        o_ref[...] = _layernorm(x, nrm_g_ref[...], nrm_b_ref[...])


# ----------------------------------------------------------------------------
# Wrappers around pallas_call
# ----------------------------------------------------------------------------
def pallas_patch_embed(x2d, w, b):
    """Token-tiled Pallas matmul over all B*T*n patch tokens: (M,K)@(K,N)+b."""
    M, K = x2d.shape
    N = w.shape[1]
    tile_m = 256 if (M % 256 == 0) else M
    return pl.pallas_call(
        _linear_bias_kernel,
        out_shape=jax.ShapeDtypeStruct((M, N), jnp.float32),
        grid=(M // tile_m,),
        in_specs=[pl.BlockSpec((tile_m, K), lambda i: (i, 0)),
                  pl.BlockSpec((K, N), lambda i: (0, 0)),
                  pl.BlockSpec((1, N), lambda i: (0, 0))],
        out_specs=pl.BlockSpec((tile_m, N), lambda i: (i, 0)),
        compiler_params=pltpu.CompilerParams(
            dimension_semantics=("parallel",),
            vmem_limit_bytes=_VMEM_LIMIT),
    )(x2d, w, b)


def pallas_transformer(x2d, pos, tp, *, heads, dim_head, batch, seq):
    """Depth-gridded transformer stack (+ fused final LayerNorm and pos-embedding add).

    x2d : (batch*seq, d_src) f32 — only the first d = pos.shape[-1] feature columns are used
          (the column slice is done in-kernel, so e.g. the temporal->spatial handoff needs no
          sliced HBM intermediate).
    pos : (seq, d) f32, added at depth step 0.
    """
    d = pos.shape[-1]
    d_src = x2d.shape[-1]
    depth = tp["wqkv"].shape[0]
    inner = heads * dim_head
    mlp_dim = tp["w1"].shape[-1]
    tokens = batch * seq

    xmap = lambda b, l: (b, 0)     # batch block, constant across depth (resident output)
    wmap = lambda b, l: (l, 0, 0)  # per-layer weight block (pipelined over depth)
    cmap2 = lambda b, l: (0, 0)    # constant 2-D inputs

    in_specs = [
        pl.BlockSpec((seq, d_src), xmap),            # x (full width; sliced in kernel)
        pl.BlockSpec((seq, d), cmap2),               # pos
        pl.BlockSpec((1, 1, d), wmap),               # ln1_g
        pl.BlockSpec((1, 1, d), wmap),               # ln1_b
        pl.BlockSpec((1, d, 3 * inner), wmap),       # wqkv (bf16)
        pl.BlockSpec((1, inner, d), wmap),           # wo   (bf16)
        pl.BlockSpec((1, 1, d), wmap),               # bo
        pl.BlockSpec((1, 1, d), wmap),               # ln2_g
        pl.BlockSpec((1, 1, d), wmap),               # ln2_b
        pl.BlockSpec((1, d, mlp_dim), wmap),         # w1   (bf16)
        pl.BlockSpec((1, 1, mlp_dim), wmap),         # b1
        pl.BlockSpec((1, mlp_dim, d), wmap),         # w2   (bf16)
        pl.BlockSpec((1, 1, d), wmap),               # b2
        pl.BlockSpec((1, d), cmap2),                 # norm_g
        pl.BlockSpec((1, d), cmap2),                 # norm_b
    ]

    kern = functools.partial(_tf_layer_kernel, depth=depth, heads=heads, dim_head=dim_head)

    return pl.pallas_call(
        kern,
        out_shape=jax.ShapeDtypeStruct((tokens, d), jnp.float32),
        grid=(batch, depth),
        in_specs=in_specs,
        out_specs=pl.BlockSpec((seq, d), xmap),
        scratch_shapes=[pltpu.VMEM((seq, d), jnp.float32)],
        compiler_params=pltpu.CompilerParams(
            dimension_semantics=("parallel", "arbitrary"),
            vmem_limit_bytes=_VMEM_LIMIT),
    )(x2d, pos,
      tp["ln1_g"], tp["ln1_b"], tp["wqkv"], tp["wo"], tp["bo"],
      tp["ln2_g"], tp["ln2_b"], tp["w1"], tp["b1"], tp["w2"], tp["b2"],
      tp["norm_g"], tp["norm_b"])


# ----------------------------------------------------------------------------
# Parameter init (deterministic, synthetic, stacked per-layer)
# ----------------------------------------------------------------------------
def _nrm(key, shape, s=0.02):
    return jax.random.normal(key, shape, jnp.float32) * s


def init_transformer(key, d, depth, heads, dim_head, mlp_dim):
    inner = heads * dim_head
    ks = jax.random.split(key, 7)
    bf = jnp.bfloat16
    return dict(
        ln1_g=jnp.ones((depth, 1, d), jnp.float32),
        ln1_b=jnp.zeros((depth, 1, d), jnp.float32),
        wqkv=_nrm(ks[0], (depth, d, 3 * inner)).astype(bf),
        wo=_nrm(ks[1], (depth, inner, d)).astype(bf),
        bo=_nrm(ks[2], (depth, 1, d), 0.01),
        ln2_g=jnp.ones((depth, 1, d), jnp.float32),
        ln2_b=jnp.zeros((depth, 1, d), jnp.float32),
        w1=_nrm(ks[3], (depth, d, mlp_dim)).astype(bf),
        b1=_nrm(ks[4], (depth, 1, mlp_dim), 0.01),
        w2=_nrm(ks[5], (depth, mlp_dim, d)).astype(bf),
        b2=_nrm(ks[6], (depth, 1, d), 0.01),
        norm_g=jnp.ones((1, d), jnp.float32),
        norm_b=jnp.zeros((1, d), jnp.float32),
    )


def init_vivit(key, cfg):
    dim, t = cfg["dim"], cfg["num_frames"]
    patch_dim = cfg["in_channels"] * cfg["patch_size"] ** 2
    num_patches = (cfg["image_size"] // cfg["patch_size"]) ** 2
    ks = jax.random.split(key, 7)
    return dict(
        patch_w=_nrm(ks[0], (patch_dim, dim)).astype(jnp.bfloat16),
        patch_b=_nrm(ks[1], (1, dim), 0.01),
        temporal_pos=_nrm(ks[2], (1, num_patches, (t + 1) * dim), 1.0),
        temporal_token=_nrm(ks[3], (1, 1, dim), 1.0),
        spatial_pos=_nrm(ks[4], (1, num_patches, dim), 1.0),
        temporal_tf=init_transformer(
            ks[5], dim * (t + 1), cfg["t_depth"], cfg["heads"], cfg["dim_head"],
            dim * cfg["scale_dim"]),
        space_tf=init_transformer(
            ks[6], dim, cfg["s_depth"], cfg["heads"], cfg["dim_head"],
            dim * cfg["scale_dim"]),
    )


# ----------------------------------------------------------------------------
# ViViT forward
# ----------------------------------------------------------------------------
def vivit_forward(x, params, cfg):
    B, T, C, H, W = x.shape
    p = cfg["patch_size"]
    dim = cfg["dim"]
    hN, wN = H // p, W // p
    n = hN * wN

    # 'b t c (h p1) (w p2) -> b t (h w) (p1 p2 c)'   (layout glue, plain JAX)
    xr = x.reshape(B, T, C, hN, p, wN, p)
    xr = xr.transpose(0, 1, 3, 5, 4, 6, 2)                    # b t h w p1 p2 c
    xr = xr.reshape(B * T * n, p * p * C)

    # Linear(patch_dim, dim): token-tiled Pallas matmul over all B*T*n tokens.
    emb = pallas_patch_embed(xr, params["patch_w"], params["patch_b"])
    emb = emb.reshape(B, T, n, dim)

    # 'b t n d -> b n (d t)'   (stride-T lane interleave -> leave to XLA glue)
    x2 = emb.transpose(0, 2, 3, 1).reshape(B, n, dim * T)
    dt = dim * T

    # Prepend the temporal token along the feature axis; the temporal pos-embedding add is
    # fused into step 0 of the temporal transformer kernel.  emb_dropout: 0.0 -> identity.
    tok = jnp.broadcast_to(params["temporal_token"], (B, n, dim))
    x3 = jnp.concatenate([tok, x2], axis=2).reshape(B * n, dim * (T + 1))   # (B*n, dim*(T+1))
    temporal_pos = params["temporal_pos"][0, :, : dt + dim]                 # (n, dim*(T+1))

    x3 = pallas_transformer(x3, temporal_pos, params["temporal_tf"],
                            heads=cfg["heads"], dim_head=cfg["dim_head"],
                            batch=B, seq=n)                                 # (B*n, dim*(T+1))

    # Spatial transformer: consumes only the first `dim` feature columns of the temporal
    # output; the column slice and the spatial pos-embedding add are fused into step 0 of
    # the spatial kernel (temporal output is passed through unchanged).
    spatial_pos = params["spatial_pos"][0]                                  # (n, dim)
    xs = pallas_transformer(x3, spatial_pos, params["space_tf"],
                            heads=cfg["heads"], dim_head=cfg["dim_head"],
                            batch=B, seq=n)                                 # (B*n, dim)

    # 'b (h w) c -> b c h w'.  The reference module hard-codes h = image_size // 2, which
    # equals image_size // patch_size for its patch_size=2 configuration.
    hh = cfg["image_size"] // cfg["patch_size"]
    return xs.reshape(B, hh, hh, dim).transpose(0, 3, 1, 2)


# ----------------------------------------------------------------------------
if __name__ == "__main__":
    cfg = dict(
        image_size=8,
        patch_size=2,
        num_frames=2,
        dim=32,
        t_depth=2,
        s_depth=2,
        heads=2,
        dim_head=8,
        in_channels=4,
        scale_dim=2,
    )

    key = jax.random.PRNGKey(0)
    kx, kp = jax.random.split(key)
    # input: (B, T, C, H, W)
    x = jax.random.normal(kx, (2, cfg["num_frames"], cfg["in_channels"],
                               cfg["image_size"], cfg["image_size"]), jnp.float32)
    params = init_vivit(kp, cfg)

    out = vivit_forward(x, params, cfg)
    out = jax.block_until_ready(out)

    expected = (2, cfg["dim"], cfg["image_size"] // cfg["patch_size"],
                cfg["image_size"] // cfg["patch_size"])
    assert out.shape == expected, (out.shape, expected)
    assert bool(jnp.all(jnp.isfinite(out)))
    print("KERNEL_OK")
</pallas_src>

<mosaic_0001>
module attributes {stable_mosaic.version = 11 : i64} {
  func.func @_linear_bias_kernel(%arg0: i32, %arg1: memref<64x16xf32, #tpu.memory_space<vmem>>, %arg2: memref<16x32xbf16, #tpu.memory_space<vmem>>, %arg3: memref<1x32xf32, #tpu.memory_space<vmem>>, %arg4: memref<64x32xf32, #tpu.memory_space<vmem>>) attributes {dimension_semantics = [#tpu.dimension_semantics<parallel>], iteration_bounds = array<i64: 1>, scalar_prefetch = 0 : i64, scratch_operands = 0 : i64, tpu.core_type = #tpu.core_type<tc>, window_params = [{transform_indices = @transform_0, window_bounds = array<i64: 64, 16>}, {pipeline_mode = #tpu.pipeline_mode<synchronous>, transform_indices = @transform_1, window_bounds = array<i64: 16, 32>}, {pipeline_mode = #tpu.pipeline_mode<synchronous>, transform_indices = @transform_2, window_bounds = array<i64: 1, 32>}, {transform_indices = @transform_3, window_bounds = array<i64: 64, 32>}]} {
    %c0 = arith.constant 0 : index
    %c0_0 = arith.constant 0 : index
    %0 = vector.load %arg1[%c0, %c0_0] : memref<64x16xf32, #tpu.memory_space<vmem>>, vector<64x16xf32>
    %1 = arith.truncf %0 : vector<64x16xf32> to vector<64x16xbf16>
    %c0_1 = arith.constant 0 : index
    %c0_2 = arith.constant 0 : index
    %2 = vector.load %arg2[%c0_1, %c0_2] : memref<16x32xbf16, #tpu.memory_space<vmem>>, vector<16x32xbf16>
    %cst = arith.constant dense<0.000000e+00> : vector<64x32xf32>
    %3 = tpu.matmul %1, %2, %cst {dimension_numbers = #tpu.dot_dimension_numbers<[1], [0], [0], [1], [0, 0, 1, 1], [], []>} : vector<64x16xbf16>, vector<16x32xbf16>, vector<64x32xf32> -> vector<64x32xf32>
    %c0_3 = arith.constant 0 : index
    %c0_4 = arith.constant 0 : index
    %4 = vector.load %arg3[%c0_3, %c0_4] : memref<1x32xf32, #tpu.memory_space<vmem>>, vector<1x32xf32>
    %5 = vector.broadcast %4 : vector<1x32xf32> to vector<64x32xf32>
    %6 = arith.addf %3, %5 : vector<64x32xf32>
    %c0_5 = arith.constant 0 : index
    %c0_6 = arith.constant 0 : index
    %7 = vector.load %arg4[%c0_5, %c0_6] : memref<64x32xf32, #tpu.memory_space<vmem>>, vector<64x32xf32>
    tpu.vector_store %arg4[%c0_5, %c0_6], %6 {strides = array<i32>} : memref<64x32xf32, #tpu.memory_space<vmem>>, vector<64x32xf32>,
    return
  }
  func.func @transform_0(%arg0: i32) -> (i32, i32) {
    %c0_i32 = arith.constant 0 : i32
    %c0_i32_0 = arith.constant 0 : i32
    return %arg0, %c0_i32 : i32, i32
  }
  func.func @transform_1(%arg0: i32) -> (i32, i32) {
    %c0_i32 = arith.constant 0 : i32
    %c0_i32_0 = arith.constant 0 : i32
    %c0_i32_1 = arith.constant 0 : i32
    return %c0_i32, %c0_i32_0 : i32, i32
  }
  func.func @transform_2(%arg0: i32) -> (i32, i32) {
    %c0_i32 = arith.constant 0 : i32
    %c0_i32_0 = arith.constant 0 : i32
    %c0_i32_1 = arith.constant 0 : i32
    return %c0_i32, %c0_i32_0 : i32, i32
  }
  func.func @transform_3(%arg0: i32) -> (i32, i32) {
    %c0_i32 = arith.constant 0 : i32
    %c0_i32_0 = arith.constant 0 : i32
    return %arg0, %c0_i32 : i32, i32
  }
}

</mosaic_0001>

<bundles_post_ra>
// kernel: tpu_custom_call.1
= control target key start
LH: loop header
LB: loop body
LE: loop exit
PB: predicated region body
PF: predicated region fallthrough
CT: control target
= control target key end

     0   :  { %vm39_vm0 = vcmask 130048   ;;  %vm81_vm1 = vcmask 261120   ;;  %s189_s1 = inlined_call_operand.vmem [shape: bf16[16,32], index: 1, kind: input, shape index: {}]   ;;  %s190_s0 = inlined_call_operand.vmem [shape: f32[64,16], index: 0, kind: input, shape index: {}]   ;;  %s191_s2 = inlined_call_operand.vmem [shape: f32[1,32], index: 2, kind: input, shape index: {}]   ;;  %s192_s3 = inlined_call_operand.vmem [shape: f32[64,32], index: 3, kind: output, shape index: {}]  }
   0x1   :  { %v102_v0 = vld [vmem:[%s189_s1] sm:$0xff]  ;;  %v16_v2 = vld [vmem:[%s190_s0 + $0x8] sm:$0xff]  ;;  %v17_v4 = vld [vmem:[%s190_s0 + $0x10] sm:$0xff] }
   0x2   :  { %v15_v1 = vld [vmem:[%s190_s0] sm:$0xff]  ;;  %v18_v5 = vld [vmem:[%s190_s0 + $0x18] sm:$0xff]  ;;  %59 = vmatpush.bf16.msra.mxu0 %v102_v0  ;;  %103 = vmatpush.bf16.msra.mxu1 %v102_v0  ;;  %v20_v8 = vld [vmem:[%s190_s0 + $0x28] sm:$0xff] }
   0x3   :  { %v23_v3 = vpack.c.bf16 %v16_v2, %v15_v1  ;;  %v19_v6 = vld [vmem:[%s190_s0 + $0x20] sm:$0xff]  ;;  %v24_v7 = vpack.c.bf16 %v18_v5, %v17_v4  ;;  %v21_v9 = vld [vmem:[%s190_s0 + $0x30] sm:$0xff]  ;;  %v22_v10 = vld [vmem:[%s190_s0 + $0x38] sm:$0xff]  ;;  %104 = vmatpush.bf16.msra.mxu2 %v102_v0  ;;  %105 = vmatpush.bf16.msra.mxu3 %v102_v0 }
   0x4   :  { %v25_v11 = vpack.c.bf16 %v20_v8, %v19_v6  ;;  %v26_v12 = vpack.c.bf16 %v22_v10, %v21_v9  ;;  %v106_v13 = vld [vmem:[%s191_s2] ss:$0 sm:$0xff] }
   0x5   :  { %98 = vmatmul.msk.bf16.vlgmr.msra.gmra.mxu0 %vm39_vm0, %v23_v3  ;;  %99 = vmatmul.msk.bf16.vlgmr.msra.gmra.mxu1 %vm39_vm0, %v24_v7 }
   0x6   :  { %100 = vmatmul.msk.bf16.vlgmr.msra.gmra.mxu2 %vm39_vm0, %v25_v11  ;;  %101 = vmatmul.msk.bf16.vlgmr.msra.gmra.mxu3 %vm39_vm0, %v26_v12 }
  0x82   :  { %v61_v14 = vpop.f32.mrf.mxu0  ;;  %v66_v15 = vpop.f32.mrf.mxu1 }
  0x83   :  { %v62_v16 = vadd.f32 %v106_v13, %v61_v14  ;;  %v67_v17 = vadd.f32 %v106_v13, %v66_v15 }
  0x85   :  { %82 = vst.msk [vmem:[%s192_s3] sm:$0xff] %vm81_vm1, %v62_v16 }
  0x86   :  { %84 = vst.msk [vmem:[%s192_s3 + $0x10] sm:$0xff] %vm81_vm1, %v67_v17 }
  0x89   :  { %v71_v18 = vpop.f32.mrf.mxu2  ;;  %v76_v19 = vpop.f32.mrf.mxu3 }
  0x8a   :  { %v72_v20 = vadd.f32 %v106_v13, %v71_v18  ;;  %v77_v21 = vadd.f32 %v106_v13, %v76_v19  ;;  %v63_v22 = vpop.f32.mrf.mxu0  ;;  %v68_v23 = vpop.f32.mrf.mxu1 }
  0x8b   :  { %v64_v24 = vadd.f32 %v106_v13, %v63_v22  ;;  %v69_v25 = vadd.f32 %v106_v13, %v68_v23 }
  0x8c   :  { %86 = vst.msk [vmem:[%s192_s3 + $0x20] sm:$0xff] %vm81_vm1, %v72_v20 }
  0x8d   :  { %88 = vst.msk [vmem:[%s192_s3 + $0x30] sm:$0xff] %vm81_vm1, %v77_v21 }
  0x8e   :  { %83 = vst.msk [vmem:[%s192_s3 + $0x8] sm:$0xff] %vm81_vm1, %v64_v24 }
  0x8f   :  { %85 = vst.msk [vmem:[%s192_s3 + $0x18] sm:$0xff] %vm81_vm1, %v69_v25 }
  0x91   :  { %v73_v26 = vpop.f32.mrf.mxu2  ;;  %v78_v27 = vpop.f32.mrf.mxu3 }
  0x92   :  { %v74_v28 = vadd.f32 %v106_v13, %v73_v26  ;;  %v79_v29 = vadd.f32 %v106_v13, %v78_v27 }
  0x94   :  { %87 = vst.msk [vmem:[%s192_s3 + $0x28] sm:$0xff] %vm81_vm1, %v74_v28 }
  0x95   :  { %89 = vst.msk [vmem:[%s192_s3 + $0x38] sm:$0xff] %vm81_vm1, %v79_v29 }

</bundles_post_ra>
